<compile_context>
chip_gen: v5e
topology: v5e:2x2
jax: 0.10.0
libtpu: 0.0.40
codegen_flags: <defaults>
</compile_context>

<pallas_src>
import functools
from typing import List, Tuple

import numpy as np

import jax
import jax.numpy as jnp
from jax.experimental import pallas as pl
from jax.experimental.pallas import tpu as pltpu


# ----------------------------- Pallas kernel ------------------------------ #
def _relation_loss_kernel(gold_ref, pred_ref, correct_ref, acc_ref):
    # gold_ref:    (tg, 1) int32 triple keys, padded rows = -1
    # pred_ref:    (1, tp) int32 triple keys, padded cols = -2 (never matches)
    # correct_ref: (1,)    int32 in SMEM — total number of matched gold triples
    # acc_ref:     (1,)    int32 SMEM scratch accumulator (grid-resident)
    i = pl.program_id(0)
    j = pl.program_id(1)

    @pl.when((i == 0) & (j == 0))
    def _():
        acc_ref[0] = 0

    # Single fused reduction over the boolean compare: exact because both
    # sets are de-duplicated with collision-free keys, so each gold key
    # matches at most one pred key and the count is additive across tiles.
    acc_ref[0] += jnp.sum(gold_ref[...] == pred_ref[...], dtype=jnp.int32)

    @pl.when((i == pl.num_programs(0) - 1) & (j == pl.num_programs(1) - 1))
    def _():
        correct_ref[0] = acc_ref[0]


@functools.lru_cache(maxsize=None)
def _build_relation_loss_fn(gmax: int, pmax: int):
    """One compiled, jitted callable per (gmax, pmax) shape bucket."""
    tg = min(gmax, 512)    # sublane-axis tile (power of two >= 8)
    tp = min(pmax, 2048)   # lane-axis tile  (power of two >= 128)
    grid = (gmax // tg, pmax // tp)

    call = pl.pallas_call(
        _relation_loss_kernel,
        out_shape=jax.ShapeDtypeStruct((1,), jnp.int32),
        grid_spec=pltpu.PrefetchScalarGridSpec(
            num_scalar_prefetch=0,
            grid=grid,
            in_specs=[
                pl.BlockSpec((tg, 1), lambda i, j: (i, 0)),
                pl.BlockSpec((1, tp), lambda i, j: (0, j)),
            ],
            out_specs=pl.BlockSpec(memory_space=pltpu.MemorySpace.SMEM),
            scratch_shapes=[pltpu.SMEM((1,), jnp.int32)],
        ),
        compiler_params=pltpu.CompilerParams(
            dimension_semantics=("arbitrary", "arbitrary"),
        ),
    )

    def fn(gold_keys, pred_keys, total_f32):
        correct = call(gold_keys, pred_keys)[0]
        # Device-side finalization: return a lazy f32 scalar, no host sync.
        return (1.0 - correct.astype(jnp.float32) / total_f32).astype(jnp.float32)

    return jax.jit(fn)


def _next_pow2(n: int, minimum: int) -> int:
    n = max(n, minimum)
    return 1 << (n - 1).bit_length()


# ------------------------------ Python glue ------------------------------- #
class RelationLoss:
    """JAX/Pallas port of the PyTorch RelationLoss module."""

    def __init__(self, relation_types: List[str], device: str = "tpu"):
        self.relation_types = relation_types
        self.device = device
        self.relation_threshold = 0.5  # unused in forward (kept for parity)

    def __call__(self, predictions, gold_relations, reduction: str = "mean"):
        return self.compute_relation_loss(predictions, gold_relations, reduction)

    def compute_relation_loss(
        self,
        predictions: List[Tuple[str, str, str, float]],
        gold_relations: List[Tuple[str, str, str]],
        reduction: str = "mean",  # ignored, as in the reference implementation
    ) -> jnp.ndarray:
        # Edge cases handled in glue, exactly like the torch short-circuits.
        if not gold_relations or len(gold_relations) == 0:
            return jnp.asarray(0.0, dtype=jnp.float32)
        if predictions is None or len(predictions) == 0:
            return jnp.asarray(1.0, dtype=jnp.float32)

        # De-duplicate (python `set` semantics).
        gold_set = set(tuple(g) for g in gold_relations)
        pred_set = set((h, r, t) for h, r, t, _ in predictions)

        # Map each distinct triple to a single int32 key (>= 0): exact and
        # collision-free, so one key compare replaces three field compares.
        key_of = {}

        def _key(trip) -> int:
            if trip not in key_of:
                key_of[trip] = len(key_of)
            return key_of[trip]

        gold_keys_list = [_key(t) for t in sorted(gold_set)]
        pred_keys_list = [_key(t) for t in sorted(pred_set)]
        total = len(gold_keys_list)

        # Shape-bucketed padding, staged entirely on the host with numpy.
        gmax = _next_pow2(len(gold_keys_list), 8)
        pmax = _next_pow2(len(pred_keys_list), 128)

        gold_keys = np.full((gmax, 1), -1, dtype=np.int32)
        gold_keys[: len(gold_keys_list), 0] = gold_keys_list
        pred_keys = np.full((1, pmax), -2, dtype=np.int32)
        pred_keys[0, : len(pred_keys_list)] = pred_keys_list

        fn = _build_relation_loss_fn(gmax, pmax)
        # Returns a lazy device scalar; callers may block when they need it.
        return fn(gold_keys, pred_keys, jnp.asarray(total, dtype=jnp.float32))


# --------------------------------- main ----------------------------------- #
if __name__ == "__main__":
    # Deterministic synthetic triples built from PRNGKey(0).
    key = jax.random.PRNGKey(0)
    entities = [f"ent_{i}" for i in range(10)]
    rel_types = ["works_at", "located_in", "part_of", "founded_by"]

    k1, k2, k3 = jax.random.split(key, 3)
    n_gold, n_pred = 8, 12
    g_idx = jax.random.randint(k1, (n_gold, 3), 0, 10)
    p_idx = jax.random.randint(k2, (n_pred, 3), 0, 10)
    scores = jax.random.uniform(k3, (n_pred,))

    gold_relations = [
        (entities[int(a)], rel_types[int(b) % 4], entities[int(c)])
        for a, b, c in g_idx.tolist()
    ]
    predictions = [
        (entities[int(a)], rel_types[int(b) % 4], entities[int(c)], float(s))
        for (a, b, c), s in zip(p_idx.tolist(), scores.tolist())
    ]
    # Force some guaranteed overlap so `correct` is nonzero.
    predictions[0] = (*gold_relations[0], 0.9)
    predictions[1] = (*gold_relations[3], 0.8)

    loss_fn = RelationLoss(relation_types=rel_types)
    loss = loss_fn(predictions, gold_relations, reduction="mean")
    loss = jax.block_until_ready(loss)

    # Pure-Python reference check.
    gold_set = set(tuple(g) for g in gold_relations)
    pred_set = set((h, r, t) for h, r, t, _ in predictions)
    ref = 1.0 - len(gold_set & pred_set) / len(gold_set)
    assert abs(float(loss) - ref) < 1e-6, (float(loss), ref)

    # Second call with the same shape buckets must reuse the cached compile.
    loss2 = jax.block_until_ready(loss_fn(predictions, gold_relations))
    assert abs(float(loss2) - ref) < 1e-6

    # Edge cases (handled in glue, like the torch short-circuits).
    assert float(loss_fn(predictions, [])) == 0.0
    assert float(loss_fn([], gold_relations)) == 1.0

    print("KERNEL_OK")
</pallas_src>

<mosaic_0001>
module attributes {stable_mosaic.version = 11 : i64} {
  func.func @_relation_loss_kernel(%arg0: i32, %arg1: i32, %arg2: memref<8x1xi32, #tpu.memory_space<vmem>>, %arg3: memref<1x128xi32, #tpu.memory_space<vmem>>, %arg4: memref<1xi32, #tpu.memory_space<smem>>, %arg5: memref<1xi32, #tpu.memory_space<smem>>) attributes {dimension_semantics = [#tpu.dimension_semantics<arbitrary>, #tpu.dimension_semantics<arbitrary>], iteration_bounds = array<i64: 1, 1>, scalar_prefetch = 0 : i64, scratch_operands = 1 : i64, tpu.core_type = #tpu.core_type<tc>, window_params = [{transform_indices = @transform_0, window_bounds = array<i64: 8, 1>}, {transform_indices = @transform_1, window_bounds = array<i64: 1, 128>}, {transform_indices = @transform_2, window_bounds = array<i64: 1>}]} {
    %c0_i32 = arith.constant 0 : i32
    %0 = arith.cmpi eq, %arg0, %c0_i32 : i32
    %c0_i32_0 = arith.constant 0 : i32
    %1 = arith.cmpi eq, %arg1, %c0_i32_0 : i32
    %2 = arith.andi %0, %1 : i1
    %3 = arith.extui %2 : i1 to i32
    %c0_i32_1 = arith.constant 0 : i32
    %4 = arith.cmpi ne, %3, %c0_i32_1 : i32
    scf.if %4 {
      %c0_i32_10 = arith.constant 0 : i32
      %c0_11 = arith.constant 0 : index
      %23 = memref.load %arg5[%c0_11] : memref<1xi32, #tpu.memory_space<smem>>
      memref.store %c0_i32_10, %arg5[%c0_11] : memref<1xi32, #tpu.memory_space<smem>>
    } else {
    }
    %c0 = arith.constant 0 : index
    %5 = memref.load %arg5[%c0] : memref<1xi32, #tpu.memory_space<smem>>
    %c0_2 = arith.constant 0 : index
    %c0_3 = arith.constant 0 : index
    %6 = vector.load %arg2[%c0_2, %c0_3] : memref<8x1xi32, #tpu.memory_space<vmem>>, vector<8x1xi32>
    %c0_4 = arith.constant 0 : index
    %c0_5 = arith.constant 0 : index
    %7 = vector.load %arg3[%c0_4, %c0_5] : memref<1x128xi32, #tpu.memory_space<vmem>>, vector<1x128xi32>
    %8 = vector.broadcast %6 : vector<8x1xi32> to vector<8x128xi32>
    %9 = vector.broadcast %7 : vector<1x128xi32> to vector<8x128xi32>
    %10 = arith.cmpi eq, %8, %9 : vector<8x128xi32>
    %11 = arith.extui %10 : vector<8x128xi1> to vector<8x128xi32>
    %12 = vector.shape_cast %11 : vector<8x128xi32> to vector<1x8x128xi32>
    %cst = arith.constant dense<0> : vector<1xi32>
    %13 = vector.multi_reduction <add>, %12, %cst [1, 2] : vector<1x8x128xi32> to vector<1xi32>
    %14 = vector.shape_cast %13 : vector<1xi32> to vector<1x1x1xi32>
    %15 = vector.extract %14[0, 0, 0] : i32 from vector<1x1x1xi32>
    %16 = arith.addi %5, %15 : i32
    %c0_6 = arith.constant 0 : index
    %17 = memref.load %arg5[%c0_6] : memref<1xi32, #tpu.memory_space<smem>>
    memref.store %16, %arg5[%c0_6] : memref<1xi32, #tpu.memory_space<smem>>
    %c0_i32_7 = arith.constant 0 : i32
    %18 = arith.cmpi eq, %arg0, %c0_i32_7 : i32
    %c0_i32_8 = arith.constant 0 : i32
    %19 = arith.cmpi eq, %arg1, %c0_i32_8 : i32
    %20 = arith.andi %18, %19 : i1
    %21 = arith.extui %20 : i1 to i32
    %c0_i32_9 = arith.constant 0 : i32
    %22 = arith.cmpi ne, %21, %c0_i32_9 : i32
    scf.if %22 {
      %c0_10 = arith.constant 0 : index
      %23 = memref.load %arg5[%c0_10] : memref<1xi32, #tpu.memory_space<smem>>
      %c0_11 = arith.constant 0 : index
      %24 = memref.load %arg4[%c0_11] : memref<1xi32, #tpu.memory_space<smem>>
      memref.store %23, %arg4[%c0_11] : memref<1xi32, #tpu.memory_space<smem>>
    } else {
    }
    return
  }
  func.func @transform_0(%arg0: i32, %arg1: i32) -> (i32, i32) {
    %c0_i32 = arith.constant 0 : i32
    %c0_i32_0 = arith.constant 0 : i32
    return %arg0, %c0_i32 : i32, i32
  }
  func.func @transform_1(%arg0: i32, %arg1: i32) -> (i32, i32) {
    %c0_i32 = arith.constant 0 : i32
    %c0_i32_0 = arith.constant 0 : i32
    return %c0_i32, %arg1 : i32, i32
  }
  func.func @transform_2(%arg0: i32, %arg1: i32) -> i32 {
    %c0_i32 = arith.constant 0 : i32
    %c0_i32_0 = arith.constant 0 : i32
    return %c0_i32 : i32
  }
}

</mosaic_0001>

<bundles_post_ra>
// kernel: fn.1
= control target key start
LH: loop header
LB: loop body
LE: loop exit
PB: predicated region body
PF: predicated region fallthrough
CT: control target
= control target key end

     0   :  { %v91_v1 = vmov 0   ;;  %s117_s0 = inlined_call_operand.vmem [shape: s32[8,1], index: 0, kind: input, shape index: {}]   ;;  %s118_s1 = inlined_call_operand.vmem [shape: s32[1,128], index: 1, kind: input, shape index: {}]   ;;  %s119_s2 = inlined_call_operand.hbm [shape: s32[1], index: 2, kind: output, shape index: {}]  }
   0x1   :  { %v21_v0 = vld [vmem:[%s117_s0] sm:$0xff]  ;;  %75 = vset.pattern.permute.xlu0 %v91_v1 }
   0x2   :  { %7 = vsyncpa [#allocation4], 0  ;;  %24 = vperm.xlu0 %75, %v21_v0   ;;  %v76_v2 = vld [vmem:[%s118_s1] ss:$0 sm:$0xff]  ;;  %s61_s13 = sshll.u32 %s119_s2, 4  ;;  %s92_s15 = smov [#allocation3]   ;;  %s62_s13 = int_to_ptr.hbm [resolvable:$true] %s61_s13 }
  0x74   :  { %v25_v3 = vpop.permute.xlu0 %24 }
  0x75   :  { %vm27_vm0 = vcmp.eq.s32.totalorder %v25_v3, %v76_v2 }
  0x76   :  { %v28_v4 = vsel %vm27_vm0, 1, %v91_v1 }
  0x77   :  { %v30_v5 = vshrl.u32 %v28_v4, 16  ;;  %v29_v6 = vand.u32 65535, %v28_v4 }
  0x79   :  { %v32_v7 = vcvt.s32.f32 %v30_v5  ;;  %v31_v8 = vcvt.s32.f32 %v29_v6 }
  0x7b   :  { %35 = vadd.xlane.f32.xlu0 %v32_v7  ;;  %33 = vadd.xlane.f32.xlu1 %v31_v8 }
  0xee   :  { %v36_v9 = vpop.xlane.xlu0 %35  ;;  %v34_v10 = vpop.xlane.xlu1 %33 }
  0xef   :  { %v38_v11 = vcvt.f32.s32 %v36_v9  ;;  %v37_v13 = vcvt.f32.s32 %v34_v10 }
  0xf1   :  { %v39_v12 = vshll.u32 %v38_v11, 16 }
  0xf3   :  { %v40_v14 = vadd.s32 %v39_v12, %v37_v13 }
  0xf5   :  { %v41_v15 = vrot.slane %v40_v14, 4 }
  0xf7   :  { %v42_v16 = vadd.s32 %v41_v15, %v40_v14 }
  0xf9   :  { %v43_v17 = vrot.slane %v42_v16, 2 }
  0xfb   :  { %v44_v18 = vadd.s32 %v43_v17, %v42_v16 }
  0xfd   :  { %v45_v19 = vrot.slane %v44_v18, 1 }
  0xff   :  { %v46_v20 = vadd.s32 %v45_v19, %v44_v18 }
 0x101   :  { %71 = vpush %v46_v20 }
 0x132   :  { %s72_s14 = spop %71 }
 0x133   :  { %55 = sst [smem:[#allocation3]] %s72_s14 }
 0x134   :  { %64 = dma.smem_to_hbm %s92_s15, 16, %s62_s13, [#allocation4]  }
 0x135   :  { %89 = dma.done.wait [#allocation4], 16  }
 0x136   :  { %90 = vsyncadd [#allocation4], 4294967280 }
 0x137   :  { %69 = sfence }
 0x138   :  { %70 = vsyncpa [#allocation4], 1 }

</bundles_post_ra>
